<compile_context>
chip_gen: v6e
topology: v6e:2x2x1
jax: 0.10.0
libtpu: 0.0.40
codegen_flags: <defaults>
</compile_context>

<pallas_src>
import functools
import math

import jax
import jax.numpy as jnp
from jax.experimental import pallas as pl
from jax.experimental.pallas import tpu as pltpu


def _round_up(n, m):
    return -(-n // m) * m


def _angle_linear_kernel(x_ref, w_ref, xlen_ref, inv_xlen_ref,
                         cos_out_ref, phi_out_ref, *, m):
    """One (out-tile, batch-tile) step.

    x_ref:        (tb, IN)  input tile, compute dtype (bf16 by default)
    w_ref:        (IN, tn)  column-normalized weight tile, compute dtype
    xlen_ref:     (tb, 1)   f32 row norms |x|
    inv_xlen_ref: (tb, 1)   f32 1/|x|
    outputs:      (tb, tn)  cos_theta*|x| and phi_theta*|x|
    """
    # MXU matmul (bf16 operands, f32 accumulation). Weight columns are unit
    # norm, so ct * (1/|x|) is already cos_theta.
    ct = jnp.dot(x_ref[...], w_ref[...], preferred_element_type=jnp.float32)

    xlen = xlen_ref[...]          # (tb, 1) f32
    inv_xlen = inv_xlen_ref[...]  # (tb, 1) f32

    cos_theta = jnp.clip(ct * inv_xlen, -1.0, 1.0)

    # cos(m*theta): the PyTorch module hard-codes the m=4 Chebyshev polynomial
    # in the phiflag=True branch (even for other m) — mirror that exactly.
    c2 = cos_theta * cos_theta
    cos_m_theta = 8.0 * c2 * c2 - 8.0 * c2 + 1.0

    # k = floor(m*acos(c)/pi) = #{ j in [1,m] : c <= cos(j*pi/m) }  (acos decreasing)
    # (-1)^k via parity (XOR) of the same masks; thresholds are compile-time consts.
    k = jnp.zeros_like(cos_theta)
    parity = jnp.zeros(cos_theta.shape, dtype=jnp.bool_)
    for j in range(1, m + 1):
        thr = math.cos(math.pi * j / m)
        b = cos_theta <= thr
        k = k + b.astype(jnp.float32)
        parity = parity ^ b
    phi_theta = jnp.where(parity, -cos_m_theta, cos_m_theta) - 2.0 * k

    cos_out_ref[...] = (cos_theta * xlen).astype(cos_out_ref.dtype)
    phi_out_ref[...] = (phi_theta * xlen).astype(phi_out_ref.dtype)


def _prepare_operands(x, weight, compute_dtype):
    """Shared by the kernel wrapper and the mixed-precision reference."""
    xf = x.astype(jnp.float32)
    xsq = jnp.sum(xf * xf, axis=1, keepdims=True)               # (B, 1)
    # Zero rows -> 0 instead of NaN/Inf (documented behavioral difference).
    inv_xlen = jnp.where(xsq > 0.0, jax.lax.rsqrt(xsq), 0.0)
    xlen = jnp.sqrt(xsq)

    wf = weight.astype(jnp.float32)
    wsq = jnp.sum(wf * wf, axis=0, keepdims=True)               # (1, OUT)
    inv_wlen = jnp.where(wsq > 0.0, jax.lax.rsqrt(wsq), 0.0)
    # renorm(2,1,1e-5)*1e5 and the later /|ww|_col cancel exactly -> unit-norm cols.
    w_n = (wf * inv_wlen).astype(compute_dtype)

    return x.astype(compute_dtype), w_n, xlen, inv_xlen


def angle_linear(x, weight, *, m=4, tb=None, tn=None,
                 compute_dtype=jnp.bfloat16, out_dtype=jnp.float32):
    """Pallas AngleLinear forward. Returns (cos_theta, phi_theta), each (B, OUT)."""
    B, IN = x.shape
    IN2, OUT = weight.shape
    assert IN == IN2

    # --- generation-aware tile / VMEM defaults -------------------------------
    try:
        kind = jax.devices()[0].device_kind.lower()
    except Exception:  # pragma: no cover
        kind = ""
    is_v5e = ("v5e" in kind) or ("v5 lite" in kind) or ("v5lite" in kind)
    is_v7 = "v7" in kind
    if tb is None:
        tb = 128 if is_v5e else 256          # fill 4x128^2 (v5e) / 2x256^2 (v6e,v7x) MXU
    if tn is None:
        tn = 1024 if is_v5e else 2048
    # Explicit scoped-VMEM budget (v5e/v6e: 128 MiB physical, v7x: 64 MiB physical).
    vmem_limit = (40 << 20) if is_v7 else (64 << 20)

    # --- tile alignment / minimal padding ------------------------------------
    tb = max(8, (min(tb, _round_up(B, 8)) // 8) * 8)
    B_pad = _round_up(B, tb)

    OUT_pad = _round_up(OUT, 128)            # pad lanes only, never to a tn multiple
    tn = max(128, (min(tn, OUT_pad) // 128) * 128)

    itemsize_c = jnp.dtype(compute_dtype).itemsize
    itemsize_o = jnp.dtype(out_dtype).itemsize

    def _vmem_need(tn_):
        w_bytes = IN * tn_ * itemsize_c * 3                 # up to triple-buffered weight
        out_bytes = 2 * tb * tn_ * itemsize_o * 2           # 2 outputs, double-buffered
        x_bytes = tb * IN * itemsize_c * 2 + tb * 4 * 4     # x + xlen/inv_xlen streams
        return w_bytes + out_bytes + x_bytes

    while tn > 128 and _vmem_need(tn) > int(0.7 * vmem_limit):
        tn -= 128
    while OUT_pad % tn:                      # tn must divide OUT_pad (128 | OUT_pad always)
        tn -= 128
    # v7x has 2 TensorCores: prefer >=2 OUT tiles so the parallel grid can split.
    if is_v7 and (OUT_pad // tn) < 2 and (B_pad // tb) < 2 and OUT_pad >= 256:
        tn = max(128, ((OUT_pad // 2) // 128) * 128)
        while OUT_pad % tn:
            tn -= 128

    # --- operands: bf16 x / unit-norm bf16 weight, f32 row norms -------------
    x_c, w_n, xlen, inv_xlen = _prepare_operands(x, weight, compute_dtype)
    if B_pad != B:
        x_c = jnp.pad(x_c, ((0, B_pad - B), (0, 0)))
        xlen = jnp.pad(xlen, ((0, B_pad - B), (0, 0)))
        inv_xlen = jnp.pad(inv_xlen, ((0, B_pad - B), (0, 0)))
    if OUT_pad != OUT:
        w_n = jnp.pad(w_n, ((0, 0), (0, OUT_pad - OUT)))

    # Deep-buffer the weight stream only when there are enough OUT tiles for it
    # to matter (hides the several-MiB weight DMA at each outer-axis boundary).
    w_spec_kwargs = {}
    if OUT_pad // tn >= 3:
        w_spec_kwargs["pipeline_mode"] = pl.Buffered(3)
    w_spec = pl.BlockSpec((IN, tn), lambda j, i: (0, j), **w_spec_kwargs)

    kernel = functools.partial(_angle_linear_kernel, m=m)
    cos_t, phi_t = pl.pallas_call(
        kernel,
        out_shape=(
            jax.ShapeDtypeStruct((B_pad, OUT_pad), out_dtype),
            jax.ShapeDtypeStruct((B_pad, OUT_pad), out_dtype),
        ),
        grid_spec=pltpu.PrefetchScalarGridSpec(
            num_scalar_prefetch=0,
            # OUT axis OUTER, batch axis INNER: weight tile stays resident across
            # all batch tiles; only x / norms / output tiles stream per step.
            grid=(OUT_pad // tn, B_pad // tb),
            in_specs=[
                pl.BlockSpec((tb, IN), lambda j, i: (i, 0)),    # x batch tile
                w_spec,                                         # weight OUT tile
                pl.BlockSpec((tb, 1), lambda j, i: (i, 0)),     # |x|
                pl.BlockSpec((tb, 1), lambda j, i: (i, 0)),     # 1/|x|
            ],
            out_specs=[
                pl.BlockSpec((tb, tn), lambda j, i: (i, j)),
                pl.BlockSpec((tb, tn), lambda j, i: (i, j)),
            ],
        ),
        compiler_params=pltpu.CompilerParams(
            dimension_semantics=("parallel", "parallel"),
            vmem_limit_bytes=vmem_limit,
        ),
    )(x_c, w_n, xlen, inv_xlen)

    return cos_t[:B, :OUT], phi_t[:B, :OUT]


def angle_linear_ref(x, weight, m=4):
    """Pure-JAX f32 reference mirroring the PyTorch forward (phiflag=True)."""
    w = weight.astype(jnp.float32)
    xf = x.astype(jnp.float32)
    col_norm = jnp.sqrt(jnp.sum(w * w, axis=0, keepdims=True))
    ww = w * jnp.where(col_norm > 1e-5, 1e-5 / (col_norm + 1e-7), 1.0) * 1e5
    xlen = jnp.sqrt(jnp.sum(xf * xf, axis=1, keepdims=True))
    wlen = jnp.sqrt(jnp.sum(ww * ww, axis=0, keepdims=True))
    cos_theta = jnp.clip(xf @ ww / xlen / wlen, -1.0, 1.0)
    cos_m_theta = 8 * cos_theta ** 4 - 8 * cos_theta ** 2 + 1
    theta = jnp.arccos(cos_theta)
    k = jnp.floor(m * theta / 3.14159265)
    phi_theta = (-1.0) ** k * cos_m_theta - 2 * k
    return cos_theta * xlen, phi_theta * xlen


def angle_linear_ref_mixed(x, weight, m=4, compute_dtype=jnp.bfloat16):
    """Reference with the same mixed precision as the kernel fast path
    (bf16 MXU operands, f32 norms / accumulation / epilogue)."""
    x_c, w_n, xlen, inv_xlen = _prepare_operands(x, weight, compute_dtype)
    ct = jnp.dot(x_c, w_n, preferred_element_type=jnp.float32)
    cos_theta = jnp.clip(ct * inv_xlen, -1.0, 1.0)
    cos_m_theta = 8 * cos_theta ** 4 - 8 * cos_theta ** 2 + 1
    theta = jnp.arccos(cos_theta)
    k = jnp.floor(m * theta / 3.14159265)
    phi_theta = (-1.0) ** k * cos_m_theta - 2 * k
    return cos_theta * xlen, phi_theta * xlen


def init_weight(key, in_features, out_features):
    """Mimic __init__: uniform(-1, 1) then renorm(2, 1, 1e-5).mul(1e5)."""
    w = jax.random.uniform(key, (in_features, out_features),
                           dtype=jnp.float32, minval=-1.0, maxval=1.0)
    col_norm = jnp.sqrt(jnp.sum(w * w, axis=0, keepdims=True))
    return w * jnp.where(col_norm > 1e-5, 1e-5 / (col_norm + 1e-7), 1.0) * 1e5


if __name__ == "__main__":
    B, IN, OUT, M = 16, 32, 16, 4

    key = jax.random.PRNGKey(0)
    kx, kw = jax.random.split(key)
    x = jax.random.normal(kx, (B, IN), dtype=jnp.float32)
    weight = init_weight(kw, IN, OUT)

    # Default fast path: bf16 MXU operands, f32 accumulation / epilogue.
    fast = jax.jit(functools.partial(angle_linear, m=M))
    cos_t, phi_t = fast(x, weight)
    jax.block_until_ready((cos_t, phi_t))
    cos_r, phi_r = angle_linear_ref_mixed(x, weight, m=M)
    assert cos_t.shape == (B, OUT) and phi_t.shape == (B, OUT)
    assert jnp.allclose(cos_t, cos_r, atol=2e-3, rtol=2e-3)
    assert jnp.allclose(phi_t, phi_r, atol=2e-3, rtol=2e-3)

    # Full-precision path vs. the PyTorch-faithful f32 reference.
    full = jax.jit(functools.partial(angle_linear, m=M, compute_dtype=jnp.float32))
    cos_f, phi_f = full(x, weight)
    jax.block_until_ready((cos_f, phi_f))
    cos_fr, phi_fr = angle_linear_ref(x, weight, m=M)
    assert jnp.allclose(cos_f, cos_fr, atol=1e-4, rtol=1e-4)
    assert jnp.allclose(phi_f, phi_fr, atol=1e-4, rtol=1e-4)

    print("KERNEL_OK")
</pallas_src>

<mosaic_0001>
module attributes {stable_mosaic.version = 11 : i64} {
  func.func @_angle_linear_kernel(%arg0: i32, %arg1: i32, %arg2: memref<16x32xbf16, #tpu.memory_space<vmem>>, %arg3: memref<32x128xbf16, #tpu.memory_space<vmem>>, %arg4: memref<16x1xf32, #tpu.memory_space<vmem>>, %arg5: memref<16x1xf32, #tpu.memory_space<vmem>>, %arg6: memref<16x128xf32, #tpu.memory_space<vmem>>, %arg7: memref<16x128xf32, #tpu.memory_space<vmem>>) attributes {dimension_semantics = [#tpu.dimension_semantics<parallel>, #tpu.dimension_semantics<parallel>], iteration_bounds = array<i64: 1, 1>, scalar_prefetch = 0 : i64, scratch_operands = 0 : i64, tpu.core_type = #tpu.core_type<tc>, window_params = [{transform_indices = @transform_0, window_bounds = array<i64: 16, 32>}, {transform_indices = @transform_1, window_bounds = array<i64: 32, 128>}, {transform_indices = @transform_2, window_bounds = array<i64: 16, 1>}, {transform_indices = @transform_3, window_bounds = array<i64: 16, 1>}, {transform_indices = @transform_4, window_bounds = array<i64: 16, 128>}, {transform_indices = @transform_5, window_bounds = array<i64: 16, 128>}]} {
    %c0 = arith.constant 0 : index
    %c0_0 = arith.constant 0 : index
    %0 = vector.load %arg2[%c0, %c0_0] : memref<16x32xbf16, #tpu.memory_space<vmem>>, vector<16x32xbf16>
    %c0_1 = arith.constant 0 : index
    %c0_2 = arith.constant 0 : index
    %1 = vector.load %arg3[%c0_1, %c0_2] : memref<32x128xbf16, #tpu.memory_space<vmem>>, vector<32x128xbf16>
    %cst = arith.constant dense<0.000000e+00> : vector<16x128xf32>
    %2 = tpu.matmul %0, %1, %cst {dimension_numbers = #tpu.dot_dimension_numbers<[1], [0], [0], [1], [0, 0, 1, 1], [], []>} : vector<16x32xbf16>, vector<32x128xbf16>, vector<16x128xf32> -> vector<16x128xf32>
    %c0_3 = arith.constant 0 : index
    %c0_4 = arith.constant 0 : index
    %3 = vector.load %arg4[%c0_3, %c0_4] : memref<16x1xf32, #tpu.memory_space<vmem>>, vector<16x1xf32>
    %c0_5 = arith.constant 0 : index
    %c0_6 = arith.constant 0 : index
    %4 = vector.load %arg5[%c0_5, %c0_6] : memref<16x1xf32, #tpu.memory_space<vmem>>, vector<16x1xf32>
    %5 = vector.broadcast %4 : vector<16x1xf32> to vector<16x128xf32>
    %6 = arith.mulf %2, %5 : vector<16x128xf32>
    %cst_7 = arith.constant -1.000000e+00 : f32
    %cst_8 = arith.constant 1.000000e+00 : f32
    %7 = vector.broadcast %cst_7 : f32 to vector<16x128xf32>
    %8 = arith.maximumf %7, %6 : vector<16x128xf32>
    %9 = vector.broadcast %cst_8 : f32 to vector<16x128xf32>
    %10 = arith.minimumf %9, %8 : vector<16x128xf32>
    %11 = arith.mulf %10, %10 : vector<16x128xf32>
    %cst_9 = arith.constant 8.000000e+00 : f32
    %12 = vector.broadcast %cst_9 : f32 to vector<16x128xf32>
    %13 = arith.mulf %12, %11 : vector<16x128xf32>
    %14 = arith.mulf %13, %11 : vector<16x128xf32>
    %cst_10 = arith.constant 8.000000e+00 : f32
    %15 = vector.broadcast %cst_10 : f32 to vector<16x128xf32>
    %16 = arith.mulf %15, %11 : vector<16x128xf32>
    %17 = arith.subf %14, %16 : vector<16x128xf32>
    %cst_11 = arith.constant 1.000000e+00 : f32
    %18 = vector.broadcast %cst_11 : f32 to vector<16x128xf32>
    %19 = arith.addf %17, %18 : vector<16x128xf32>
    %cst_12 = arith.constant 0.000000e+00 : f32
    %20 = vector.broadcast %cst_12 : f32 to vector<16x128xf32>
    %false = arith.constant false
    %21 = vector.broadcast %false : i1 to vector<16x128xi1>
    %cst_13 = arith.constant 0.707106769 : f32
    %22 = vector.broadcast %cst_13 : f32 to vector<16x128xf32>
    %23 = arith.cmpf ole, %10, %22 : vector<16x128xf32>
    %24 = arith.extui %23 : vector<16x128xi1> to vector<16x128xi32>
    %25 = arith.sitofp %24 : vector<16x128xi32> to vector<16x128xf32>
    %26 = arith.addf %20, %25 : vector<16x128xf32>
    %27 = arith.xori %21, %23 : vector<16x128xi1>
    %cst_14 = arith.constant 6.12323426E-17 : f32
    %28 = vector.broadcast %cst_14 : f32 to vector<16x128xf32>
    %29 = arith.cmpf ole, %10, %28 : vector<16x128xf32>
    %30 = arith.extui %29 : vector<16x128xi1> to vector<16x128xi32>
    %31 = arith.sitofp %30 : vector<16x128xi32> to vector<16x128xf32>
    %32 = arith.addf %26, %31 : vector<16x128xf32>
    %33 = arith.xori %27, %29 : vector<16x128xi1>
    %cst_15 = arith.constant -0.707106769 : f32
    %34 = vector.broadcast %cst_15 : f32 to vector<16x128xf32>
    %35 = arith.cmpf ole, %10, %34 : vector<16x128xf32>
    %36 = arith.extui %35 : vector<16x128xi1> to vector<16x128xi32>
    %37 = arith.sitofp %36 : vector<16x128xi32> to vector<16x128xf32>
    %38 = arith.addf %32, %37 : vector<16x128xf32>
    %39 = arith.xori %33, %35 : vector<16x128xi1>
    %cst_16 = arith.constant -1.000000e+00 : f32
    %40 = vector.broadcast %cst_16 : f32 to vector<16x128xf32>
    %41 = arith.cmpf ole, %10, %40 : vector<16x128xf32>
    %42 = arith.extui %41 : vector<16x128xi1> to vector<16x128xi32>
    %43 = arith.sitofp %42 : vector<16x128xi32> to vector<16x128xf32>
    %44 = arith.addf %38, %43 : vector<16x128xf32>
    %45 = arith.xori %39, %41 : vector<16x128xi1>
    %cst_17 = arith.constant 0.000000e+00 : f32
    %46 = vector.broadcast %cst_17 : f32 to vector<16x128xf32>
    %47 = arith.subf %46, %19 : vector<16x128xf32>
    %48 = arith.select %45, %47, %19 : vector<16x128xi1>, vector<16x128xf32>
    %cst_18 = arith.constant 2.000000e+00 : f32
    %49 = vector.broadcast %cst_18 : f32 to vector<16x128xf32>
    %50 = arith.mulf %49, %44 : vector<16x128xf32>
    %51 = arith.subf %48, %50 : vector<16x128xf32>
    %52 = vector.broadcast %3 : vector<16x1xf32> to vector<16x128xf32>
    %53 = arith.mulf %10, %52 : vector<16x128xf32>
    %c0_19 = arith.constant 0 : index
    %c0_20 = arith.constant 0 : index
    %54 = vector.load %arg6[%c0_19, %c0_20] : memref<16x128xf32, #tpu.memory_space<vmem>>, vector<16x128xf32>
    tpu.vector_store %arg6[%c0_19, %c0_20], %53 {strides = array<i32>} : memref<16x128xf32, #tpu.memory_space<vmem>>, vector<16x128xf32>,
    %55 = vector.broadcast %3 : vector<16x1xf32> to vector<16x128xf32>
    %56 = arith.mulf %51, %55 : vector<16x128xf32>
    %c0_21 = arith.constant 0 : index
    %c0_22 = arith.constant 0 : index
    %57 = vector.load %arg7[%c0_21, %c0_22] : memref<16x128xf32, #tpu.memory_space<vmem>>, vector<16x128xf32>
    tpu.vector_store %arg7[%c0_21, %c0_22], %56 {strides = array<i32>} : memref<16x128xf32, #tpu.memory_space<vmem>>, vector<16x128xf32>,
    return
  }
  func.func @transform_0(%arg0: i32, %arg1: i32) -> (i32, i32) {
    %c0_i32 = arith.constant 0 : i32
    %c0_i32_0 = arith.constant 0 : i32
    return %arg1, %c0_i32 : i32, i32
  }
  func.func @transform_1(%arg0: i32, %arg1: i32) -> (i32, i32) {
    %c0_i32 = arith.constant 0 : i32
    %c0_i32_0 = arith.constant 0 : i32
    return %c0_i32, %arg0 : i32, i32
  }
  func.func @transform_2(%arg0: i32, %arg1: i32) -> (i32, i32) {
    %c0_i32 = arith.constant 0 : i32
    %c0_i32_0 = arith.constant 0 : i32
    return %arg1, %c0_i32 : i32, i32
  }
  func.func @transform_3(%arg0: i32, %arg1: i32) -> (i32, i32) {
    %c0_i32 = arith.constant 0 : i32
    %c0_i32_0 = arith.constant 0 : i32
    return %arg1, %c0_i32 : i32, i32
  }
  func.func @transform_4(%arg0: i32, %arg1: i32) -> (i32, i32) {
    %c0_i32 = arith.constant 0 : i32
    return %arg1, %arg0 : i32, i32
  }
  func.func @transform_5(%arg0: i32, %arg1: i32) -> (i32, i32) {
    %c0_i32 = arith.constant 0 : i32
    return %arg1, %arg0 : i32, i32
  }
}

</mosaic_0001>

<bundles_post_ra>
// kernel: angle_linear.1
= control target key start
LH: loop header
LB: loop body
LE: loop exit
PB: predicated region body
PF: predicated region fallthrough
CT: control target
= control target key end

     0   :  { %11 = vsyncpa [#allocation3], 0  ;;  %v297_v1 = vmov 0.0   ;;  %vm298_vm0 = vmmov 0   ;;  %v299_v5 = vmov 0   ;;  %s398_s0 = inlined_call_operand.vmem [shape: bf16[16,32], index: 0, kind: input, shape index: {}]   ;;  %s399_s1 = inlined_call_operand.vmem [shape: bf16[32,128], index: 1, kind: input, shape index: {}]   ;;  %s400_s2 = inlined_call_operand.vmem [shape: f32[16,1], index: 2, kind: input, shape index: {}]   ;;  %s401_s3 = inlined_call_operand.vmem [shape: f32[16,1], index: 3, kind: input, shape index: {}]   ;;  %s402_s4 = inlined_call_operand.hbm [shape: f32[16,128], index: 4, kind: output, shape index: {0}]   ;;  %s403_s5 = inlined_call_operand.hbm [shape: f32[16,128], index: 5, kind: output, shape index: {1}]  }
   0x1   :  { %v250_v0 = vld [vmem:[%s399_s1 + $0x8] sm:$0xff]   ;;  %233 = vmatprep.subr.bf16.mxu0 %v297_v1  ;;  %v251_v2 = vld [vmem:[%s399_s1] sm:$0xff]   ;;  %237 = vmatprep.mubr.msk.bf16.mxu0 %vm298_vm0, %v297_v1 }
   0x2   :  { %234 = vmatpush3.bf16.msra.mxu0 %v250_v0  ;;  %v92_v3 = vld [vmem:[%s401_s3] sm:$0xff]  ;;  %248 = vset.pattern.permute.xlu0 %v299_v5 }
   0x3   :  { %235 = vmatprep.subr.bf16.mxu0 %v297_v1  ;;  %v90_v4 = vld [vmem:[%s400_s2] sm:$0xff]  ;;  %249 = vset.pattern.permute.xlu1 %v299_v5 }
   0x4   :  { %12 = vsyncpa [#allocation5], 0  ;;  %v252_v6 = vld [vmem:[%s398_s0] sm:$0xff]   ;;  %96 = vperm.xlu0 %248, %v92_v3   ;;  %168 = vperm.xlu1 %249, %v90_v4   ;;  %vm45_vm1 = vcmask 261120   ;;  %v93_v7 = vld [vmem:[%s401_s3 + $0x8] sm:$0xff]  ;;  %s300_s0 = smov [#allocation2]  }
   0x5   :  { %v91_v8 = vld [vmem:[%s400_s2 + $0x8] sm:$0xff]  ;;  %s189_s2 = sshll.u32 %s300_s0, 4  ;;  %s190_s2 = int_to_ptr.vmem [resolvable:$true] %s189_s2 }
   0x6   :  { %236 = vmatpush3.bf16.msra.mxu0 %v251_v2  ;;  %s253_s3 = scalar_lea.vmem %s190_s2, 256  ;;  %p258_p1 = scmp.lt.s32.totalorder %s190_s2, %s190_s2 }
   0x7   :  { %p254_p0 = scmp.ne.s32.totalorder %s190_s2, %s253_s3  ;;  %p259_p2 = scmp.lt.s32.totalorder %s253_s3, %s253_s3 }
   0x8   :  { %101 = vperm.xlu0 %248, %v93_v7   ;;  %173 = vperm.xlu1 %249, %v91_v8  }
   0x9   :  { %238 = vmatmul.mubr.msk.bf16.vlgmr.msra.gmra.mxu0 %vm45_vm1, %v252_v6  ;;  %p260_p3 = por %p259_p2, %p258_p1 }
   0xb   :  { %p261_p4 = pnand %p260_p3, %p254_p0 }
  0x7f   :  { %v97_v9 = vpop.permute.xlu0 %96  ;;  %v358_v14 = vpop.permute.xlu1 %168 }
  0x83   :  { %v102_v20 = vpop.permute.xlu0 %101  ;;  %v174_v32 = vpop.permute.xlu1 %173 }
  0xc9   :  { %v83_v10 = vpop.f32.mrf.mxu0 }
  0xca   :  { %v104_v11 = vmul.f32 %v97_v9, %v83_v10 }
  0xcb   :  { %v239_v12 = vpop.f32.mrf.mxu0 }
  0xcc   :  { %v220_v13 = vclamps-f32 %v104_v11, 1.0 }
  0xcd   :  { %v86_v15 = vpop.f32.mrf.mxu0 }
  0xce   :  { %v110_v16 = vmul.f32 %v220_v13, %v220_v13  ;;  %vm120_vm2 = vcmp.le.f32.partialorder %v220_v13, 0.70710677  ;;  %vm128_vm3 = vcmp.le.f32.partialorder %v220_v13, 6.123234e-17  ;;  %vm138_vm4 = vcmp.le.f32.partialorder %v220_v13, -0.70710677 }
  0xcf   :  { %v222_v17 = vsel %vm120_vm2, 1.0, %v297_v1  ;;  %v224_v18 = vsel %vm128_vm3, 1.0, %v297_v1  ;;  %v240_v19 = vpop.f32.mrf.mxu0  ;;  %vm148_vm5 = vcmp.le.f32.partialorder %v220_v13, -1.0  ;;  %v176_v23 = vmul.f32 %v220_v13, %v358_v14  ;;  %vm136_vm6 = vmxor %vm120_vm2, %vm128_vm3 }
  0xd0   :  { %v112_v21 = vmul.f32 8.0, %v110_v16  ;;  %v134_v22 = vadd.f32 %v224_v18, %v222_v17  ;;  %v226_v24 = vsel %vm138_vm4, 1.0, %v297_v1  ;;  %v105_v25 = vmul.f32 %v102_v20, %v86_v15  ;;  %vm146_vm10 = vmxor %vm136_vm6, %vm138_vm4 }
  0xd1   :  { %178 = vst [vmem:[#allocation2] sm:$0xff] %v176_v23  ;;  %v228_v28 = vsel %vm148_vm5, 1.0, %v297_v1  ;;  %vm156_vm12 = vmxor %vm146_vm10, %vm148_vm5 }
  0xd2   :  { %v114_v26 = vmul.f32 %v112_v21, %v110_v16  ;;  %v144_v27 = vadd.f32 %v226_v24, %v134_v22  ;;  %v221_v29 = vclamps-f32 %v105_v25, 1.0 }
  0xd4   :  { %v116_v30 = vsub.f32 %v114_v26, %v112_v21  ;;  %v154_v31 = vadd.f32 %v228_v28, %v144_v27  ;;  %v111_v33 = vmul.f32 %v221_v29, %v221_v29  ;;  %vm121_vm7 = vcmp.le.f32.partialorder %v221_v29, 0.70710677 }
  0xd5   :  { %vm129_vm8 = vcmp.le.f32.partialorder %v221_v29, 6.123234e-17  ;;  %vm139_vm9 = vcmp.le.f32.partialorder %v221_v29, -0.70710677  ;;  %v223_v35 = vsel %vm121_vm7, 1.0, %v297_v1  ;;  %vm149_vm11 = vcmp.le.f32.partialorder %v221_v29, -1.0 }
  0xd6   :  { %v118_v34 = vadd.f32 1.0, %v116_v30  ;;  %v225_v36 = vsel %vm129_vm8, 1.0, %v297_v1  ;;  %v113_v37 = vmul.f32 8.0, %v111_v33  ;;  %v227_v40 = vsel %vm139_vm9, 1.0, %v297_v1  ;;  %vm381_vm13 = vmxor %vm121_vm7, %vm129_vm8 }
  0xd7   :  { %v135_v38 = vadd.f32 %v225_v36, %v223_v35  ;;  %v177_v41 = vmul.f32 %v221_v29, %v174_v32  ;;  %v162_v42 = vmul.f32 2.0, %v154_v31  ;;  %v229_v49 = vsel %vm149_vm11, 1.0, %v297_v1 }
  0xd8   :  { %v158_v39 = vsub.f32 0.0, %v118_v34  ;;  %v115_v43 = vmul.f32 %v113_v37, %v111_v33 }
  0xd9   :  { %v145_v44 = vadd.f32 %v227_v40, %v135_v38  ;;  %179 = vst [vmem:[#allocation2 + $0x8] sm:$0xff] %v177_v41 }
  0xda   :  { %v160_v45 = vsel %vm156_vm12, %v158_v39, %v118_v34  ;;  %v117_v48 = vsub.f32 %v115_v43, %v113_v37 }
  0xdb   :  { %v164_v47 = vsub.f32 %v160_v45, %v162_v42 }
  0xdc   :  { %264 = shalt.err (!%p261_p4)
}
  0xdd   :  { %s301_s6 = smov 128   ;;  %s302_s7 = smov 8   ;;  %v155_v50 = vadd.f32 %v229_v49, %v145_v44  ;;  %v180_v51 = vmul.f32 %v358_v14, %v164_v47  ;;  %v119_v52 = vadd.f32 1.0, %v117_v48  ;;  %vm147_vm14 = vmxor %vm381_vm13, %vm139_vm9 }
  0xde   :  { %195 = dma.vmem_to_hbm [thread:$0]  %s190_s2, 256, %s402_s4, [#allocation3], %s301_s6, %s301_s6, %s302_s7   ;;  %vm157_vm15 = vmxor %vm147_vm14, %vm149_vm11 }
  0xdf   :  { %182 = vst [vmem:[#allocation4] sm:$0xff] %v180_v51  ;;  %v159_v53 = vsub.f32 0.0, %v119_v52  ;;  %v163_v54 = vmul.f32 2.0, %v155_v50  ;;  %s303_s10 = smov [#allocation4]  }
  0xe0   :  { %s201_s11 = sshll.u32 %s303_s10, 4  ;;  %s202_s11 = int_to_ptr.vmem [resolvable:$true] %s201_s11 }
  0xe1   :  { %v161_v55 = vsel %vm157_vm15, %v159_v53, %v119_v52  ;;  %s273_s4 = scalar_lea.vmem %s202_s11, 256  ;;  %p278_p6 = scmp.lt.s32.totalorder %s202_s11, %s202_s11 }
  0xe2   :  { %v165_v56 = vsub.f32 %v161_v55, %v163_v54  ;;  %p274_p5 = scmp.ne.s32.totalorder %s202_s11, %s273_s4  ;;  %p279_p7 = scmp.lt.s32.totalorder %s273_s4, %s273_s4 }
  0xe4   :  { %v181_v57 = vmul.f32 %v174_v32, %v165_v56  ;;  %p280_p8 = por %p279_p7, %p278_p6 }
  0xe6   :  { %183 = vst [vmem:[#allocation4 + $0x8] sm:$0xff] %v181_v57  ;;  %p281_p9 = pnand %p280_p8, %p274_p5 }
  0xe8   :  { %284 = shalt.err (!%p281_p9)
}
  0xe9   :  { %207 = dma.vmem_to_hbm [thread:$0]  %s202_s11, 256, %s403_s5, [#allocation5], %s301_s6, %s301_s6, %s302_s7  }
  0xea   :  { %293 = dma.done.wait [#allocation3], 256  }
  0xeb   :  { %294 = vsyncadd [#allocation3], 4294967040 }
  0xec   :  { %295 = dma.done.wait [#allocation5], 256  }
  0xed   :  { %296 = vsyncadd [#allocation5], 4294967040 }
  0xee   :  { %214 = vsyncpa [#allocation3], 1 }
  0xef   :  { %215 = vsyncpa [#allocation5], 1 }

</bundles_post_ra>
